<compile_context>
chip_gen: v7x
topology: tpu7x:2x2x1
jax: 0.10.0
libtpu: 0.0.40
codegen_flags: <defaults>
</compile_context>

<pallas_src>
import jax
import jax.numpy as jnp
from jax import lax
from jax.experimental import pallas as pl
from jax.experimental.pallas import tpu as pltpu


def lstm_head_kernel(tok_ref, eproj_ref, whh_ref, wout_ref, bout_ref, out_ref):
    S = tok_ref.shape[0]          # sequence length (static)
    H = whh_ref.shape[0]          # hidden dim

    # Read the recurrent weight once; reused across the unrolled recurrence.
    whh = whh_ref[...]                                                # [H, 4H]

    def step(t, carry):
        h, c = carry
        tok = tok_ref[t]                                              # SMEM scalar read
        # Pre-projected gate inputs: (x_t @ W_ih + b_ih + b_hh) looked up by token id.
        pre = eproj_ref[pl.ds(tok, 1), :]                             # [1, 4H]
        gates = pre + jnp.dot(h, whh, preferred_element_type=jnp.float32)  # [1, 4H]
        # Two full-width EUP activations over the whole 128-lane row, then lane slices.
        sig = jax.nn.sigmoid(gates)
        th = jnp.tanh(gates)
        i_g = sig[:, 0:H]
        f_g = sig[:, H:2 * H]
        g_g = th[:, 2 * H:3 * H]
        o_g = sig[:, 3 * H:4 * H]
        c = f_g * c + i_g * g_g
        h = o_g * jnp.tanh(c)
        return (h, c)

    h0 = jnp.zeros((1, H), jnp.float32)
    c0 = jnp.zeros((1, H), jnp.float32)
    # Fully unrolled short fixed-trip-count recurrence.
    h_last, _ = lax.fori_loop(0, S, step, (h0, c0), unroll=True)

    # Classifier head + numerically-stable log_softmax on the final hidden state.
    logits = (jnp.dot(h_last, wout_ref[...], preferred_element_type=jnp.float32)
              + bout_ref[...])                                        # [1, C]
    m = jnp.max(logits, axis=-1, keepdims=True)
    z = logits - m
    lse = jnp.log(jnp.sum(jnp.exp(z), axis=-1, keepdims=True))
    out_ref[...] = z - lse


def lstm_spooky_forward(tokens, params):
    # Parameter-only precompute (JAX glue): token -> gate-projection table.
    # E_proj[v] = embedding[v] @ W_ih^T + (b_ih + b_hh);  shape [vocab, 4H] (~25.6 KB).
    eproj = (jnp.dot(params["embedding"], params["w_ih_t"],
                     preferred_element_type=jnp.float32)
             + params["b"])                                           # [V, 4H]
    C = params["b_out"].shape[-1]
    log_probs = pl.pallas_call(
        lstm_head_kernel,
        out_shape=jax.ShapeDtypeStruct((1, C), jnp.float32),
        in_specs=[
            pl.BlockSpec(memory_space=pltpu.MemorySpace.SMEM),        # tokens [S] int32
            pl.BlockSpec(memory_space=pltpu.MemorySpace.VMEM),        # eproj  [V, 4H]
            pl.BlockSpec(memory_space=pltpu.MemorySpace.VMEM),        # w_hh_t [H, 4H]
            pl.BlockSpec(memory_space=pltpu.MemorySpace.VMEM),        # w_out_t [H, C]
            pl.BlockSpec(memory_space=pltpu.MemorySpace.VMEM),        # b_out  [1, C]
        ],
        out_specs=pl.BlockSpec(memory_space=pltpu.MemorySpace.VMEM),
    )(tokens, eproj, params["w_hh_t"], params["w_out_t"], params["b_out"])
    return log_probs[0]                                               # [C]


def reference_forward(tokens, params):
    embeds = jnp.take(params["embedding"], tokens, axis=0)
    H = params["w_hh_t"].shape[0]
    h = jnp.zeros((1, H), jnp.float32)
    c = jnp.zeros((1, H), jnp.float32)
    for t in range(tokens.shape[0]):
        x = embeds[t:t + 1, :]
        gates = x @ params["w_ih_t"] + h @ params["w_hh_t"] + params["b"]
        i_g = jax.nn.sigmoid(gates[:, 0:H])
        f_g = jax.nn.sigmoid(gates[:, H:2 * H])
        g_g = jnp.tanh(gates[:, 2 * H:3 * H])
        o_g = jax.nn.sigmoid(gates[:, 3 * H:4 * H])
        c = f_g * c + i_g * g_g
        h = o_g * jnp.tanh(c)
    logits = h @ params["w_out_t"] + params["b_out"]
    return jax.nn.log_softmax(logits, axis=-1)[0]


def init_params(key, vocab_size, embedding_dim, hidden_dim, num_classes):
    k_emb, k_ih, k_hh, k_bih, k_bhh, k_w, k_b = jax.random.split(key, 7)
    bound = 1.0 / jnp.sqrt(hidden_dim)
    # PyTorch shapes: weight_ih [4H, E], weight_hh [4H, H], linear.weight [C, H].
    # Stored transposed for x @ W matmuls (PyTorch gate order i, f, g, o).
    w_ih = jax.random.uniform(k_ih, (4 * hidden_dim, embedding_dim), jnp.float32, -bound, bound)
    w_hh = jax.random.uniform(k_hh, (4 * hidden_dim, hidden_dim), jnp.float32, -bound, bound)
    b_ih = jax.random.uniform(k_bih, (4 * hidden_dim,), jnp.float32, -bound, bound)
    b_hh = jax.random.uniform(k_bhh, (4 * hidden_dim,), jnp.float32, -bound, bound)
    w_out = jax.random.uniform(k_w, (num_classes, hidden_dim), jnp.float32, -bound, bound)
    b_out = jax.random.uniform(k_b, (num_classes,), jnp.float32, -bound, bound)
    return {
        "embedding": jax.random.normal(k_emb, (vocab_size, embedding_dim), jnp.float32),
        "w_ih_t": w_ih.T,                                  # [E, 4H]
        "w_hh_t": w_hh.T,                                  # [H, 4H]
        "b": (b_ih + b_hh)[None, :],                       # [1, 4H]
        "w_out_t": w_out.T,                                # [H, C]
        "b_out": b_out[None, :],                           # [1, C]
    }


if __name__ == "__main__":
    vocab_size = 50
    embedding_dim = 16
    hidden_dim = 32
    num_classes = 3
    seq_len = 8

    key = jax.random.PRNGKey(0)
    k_params, k_tokens = jax.random.split(key)
    params = init_params(k_params, vocab_size, embedding_dim, hidden_dim, num_classes)
    tokens = jax.random.randint(k_tokens, (seq_len,), 0, vocab_size, dtype=jnp.int32)

    out = lstm_spooky_forward(tokens, params)
    out = jax.block_until_ready(out)

    ref = reference_forward(tokens, params)
    assert out.shape == (num_classes,)
    assert jnp.allclose(out, ref, atol=1e-5), (out, ref)

    print("KERNEL_OK")
</pallas_src>

<mosaic_0001>
module attributes {stable_mosaic.version = 11 : i64} {
  func.func @lstm_head_kernel(%arg0: memref<8xi32, #tpu.memory_space<smem>>, %arg1: memref<50x128xf32, #tpu.memory_space<vmem>>, %arg2: memref<32x128xf32, #tpu.memory_space<vmem>>, %arg3: memref<32x3xf32, #tpu.memory_space<vmem>>, %arg4: memref<1x3xf32, #tpu.memory_space<vmem>>, %arg5: memref<1x3xf32, #tpu.memory_space<vmem>>) attributes {dimension_semantics = [], scalar_prefetch = 0 : i64, scratch_operands = 0 : i64, tpu.core_type = #tpu.core_type<tc>} {
    %c0 = arith.constant 0 : index
    %c0_0 = arith.constant 0 : index
    %0 = vector.load %arg2[%c0, %c0_0] : memref<32x128xf32, #tpu.memory_space<vmem>>, vector<32x128xf32>
    %cst = arith.constant 0.000000e+00 : f32
    %1 = vector.broadcast %cst : f32 to vector<1x32xf32>
    %cst_1 = arith.constant 0.000000e+00 : f32
    %2 = vector.broadcast %cst_1 : f32 to vector<1x32xf32>
    %c0_i32 = arith.constant 0 : i32
    %3 = arith.index_cast %c0_i32 : i32 to index
    %4 = memref.load %arg0[%3] : memref<8xi32, #tpu.memory_space<smem>>
    %5 = arith.index_cast %4 : i32 to index
    %c0_2 = arith.constant 0 : index
    %6 = vector.load %arg1[%5, %c0_2] : memref<50x128xf32, #tpu.memory_space<vmem>>, vector<1x128xf32>
    %cst_3 = arith.constant dense<0.000000e+00> : vector<1x128xf32>
    %7 = tpu.matmul %1, %0, %cst_3 {dimension_numbers = #tpu.dot_dimension_numbers<[1], [0], [0], [1], [0, 0, 1, 1], [], []>} : vector<1x32xf32>, vector<32x128xf32>, vector<1x128xf32> -> vector<1x128xf32>
    %8 = arith.addf %6, %7 : vector<1x128xf32>
    %9 = arith.negf %8 : vector<1x128xf32>
    %10 = math.exp %9 : vector<1x128xf32>
    %cst_4 = arith.constant 1.000000e+00 : f32
    %11 = vector.broadcast %cst_4 : f32 to vector<1x128xf32>
    %12 = arith.addf %11, %10 : vector<1x128xf32>
    %13 = arith.divf %11, %12 : vector<1x128xf32>
    %14 = math.tanh %8 : vector<1x128xf32>
    %15 = vector.extract_strided_slice %13 {offsets = [0, 0], sizes = [1, 32], strides = [1, 1]} : vector<1x128xf32> to vector<1x32xf32>
    %16 = vector.extract_strided_slice %13 {offsets = [0, 32], sizes = [1, 32], strides = [1, 1]} : vector<1x128xf32> to vector<1x32xf32>
    %17 = vector.extract_strided_slice %14 {offsets = [0, 64], sizes = [1, 32], strides = [1, 1]} : vector<1x128xf32> to vector<1x32xf32>
    %18 = vector.extract_strided_slice %13 {offsets = [0, 96], sizes = [1, 32], strides = [1, 1]} : vector<1x128xf32> to vector<1x32xf32>
    %19 = arith.mulf %16, %2 : vector<1x32xf32>
    %20 = arith.mulf %15, %17 : vector<1x32xf32>
    %21 = arith.addf %19, %20 : vector<1x32xf32>
    %22 = math.tanh %21 : vector<1x32xf32>
    %23 = arith.mulf %18, %22 : vector<1x32xf32>
    %c1_i32 = arith.constant 1 : i32
    %24 = arith.index_cast %c1_i32 : i32 to index
    %25 = memref.load %arg0[%24] : memref<8xi32, #tpu.memory_space<smem>>
    %26 = arith.index_cast %25 : i32 to index
    %c0_5 = arith.constant 0 : index
    %27 = vector.load %arg1[%26, %c0_5] : memref<50x128xf32, #tpu.memory_space<vmem>>, vector<1x128xf32>
    %cst_6 = arith.constant dense<0.000000e+00> : vector<1x128xf32>
    %28 = tpu.matmul %23, %0, %cst_6 {dimension_numbers = #tpu.dot_dimension_numbers<[1], [0], [0], [1], [0, 0, 1, 1], [], []>} : vector<1x32xf32>, vector<32x128xf32>, vector<1x128xf32> -> vector<1x128xf32>
    %29 = arith.addf %27, %28 : vector<1x128xf32>
    %30 = arith.negf %29 : vector<1x128xf32>
    %31 = math.exp %30 : vector<1x128xf32>
    %cst_7 = arith.constant 1.000000e+00 : f32
    %32 = vector.broadcast %cst_7 : f32 to vector<1x128xf32>
    %33 = arith.addf %32, %31 : vector<1x128xf32>
    %34 = arith.divf %32, %33 : vector<1x128xf32>
    %35 = math.tanh %29 : vector<1x128xf32>
    %36 = vector.extract_strided_slice %34 {offsets = [0, 0], sizes = [1, 32], strides = [1, 1]} : vector<1x128xf32> to vector<1x32xf32>
    %37 = vector.extract_strided_slice %34 {offsets = [0, 32], sizes = [1, 32], strides = [1, 1]} : vector<1x128xf32> to vector<1x32xf32>
    %38 = vector.extract_strided_slice %35 {offsets = [0, 64], sizes = [1, 32], strides = [1, 1]} : vector<1x128xf32> to vector<1x32xf32>
    %39 = vector.extract_strided_slice %34 {offsets = [0, 96], sizes = [1, 32], strides = [1, 1]} : vector<1x128xf32> to vector<1x32xf32>
    %40 = arith.mulf %37, %21 : vector<1x32xf32>
    %41 = arith.mulf %36, %38 : vector<1x32xf32>
    %42 = arith.addf %40, %41 : vector<1x32xf32>
    %43 = math.tanh %42 : vector<1x32xf32>
    %44 = arith.mulf %39, %43 : vector<1x32xf32>
    %c2_i32 = arith.constant 2 : i32
    %45 = arith.index_cast %c2_i32 : i32 to index
    %46 = memref.load %arg0[%45] : memref<8xi32, #tpu.memory_space<smem>>
    %47 = arith.index_cast %46 : i32 to index
    %c0_8 = arith.constant 0 : index
    %48 = vector.load %arg1[%47, %c0_8] : memref<50x128xf32, #tpu.memory_space<vmem>>, vector<1x128xf32>
    %cst_9 = arith.constant dense<0.000000e+00> : vector<1x128xf32>
    %49 = tpu.matmul %44, %0, %cst_9 {dimension_numbers = #tpu.dot_dimension_numbers<[1], [0], [0], [1], [0, 0, 1, 1], [], []>} : vector<1x32xf32>, vector<32x128xf32>, vector<1x128xf32> -> vector<1x128xf32>
    %50 = arith.addf %48, %49 : vector<1x128xf32>
    %51 = arith.negf %50 : vector<1x128xf32>
    %52 = math.exp %51 : vector<1x128xf32>
    %cst_10 = arith.constant 1.000000e+00 : f32
    %53 = vector.broadcast %cst_10 : f32 to vector<1x128xf32>
    %54 = arith.addf %53, %52 : vector<1x128xf32>
    %55 = arith.divf %53, %54 : vector<1x128xf32>
    %56 = math.tanh %50 : vector<1x128xf32>
    %57 = vector.extract_strided_slice %55 {offsets = [0, 0], sizes = [1, 32], strides = [1, 1]} : vector<1x128xf32> to vector<1x32xf32>
    %58 = vector.extract_strided_slice %55 {offsets = [0, 32], sizes = [1, 32], strides = [1, 1]} : vector<1x128xf32> to vector<1x32xf32>
    %59 = vector.extract_strided_slice %56 {offsets = [0, 64], sizes = [1, 32], strides = [1, 1]} : vector<1x128xf32> to vector<1x32xf32>
    %60 = vector.extract_strided_slice %55 {offsets = [0, 96], sizes = [1, 32], strides = [1, 1]} : vector<1x128xf32> to vector<1x32xf32>
    %61 = arith.mulf %58, %42 : vector<1x32xf32>
    %62 = arith.mulf %57, %59 : vector<1x32xf32>
    %63 = arith.addf %61, %62 : vector<1x32xf32>
    %64 = math.tanh %63 : vector<1x32xf32>
    %65 = arith.mulf %60, %64 : vector<1x32xf32>
    %c3_i32 = arith.constant 3 : i32
    %66 = arith.index_cast %c3_i32 : i32 to index
    %67 = memref.load %arg0[%66] : memref<8xi32, #tpu.memory_space<smem>>
    %68 = arith.index_cast %67 : i32 to index
    %c0_11 = arith.constant 0 : index
    %69 = vector.load %arg1[%68, %c0_11] : memref<50x128xf32, #tpu.memory_space<vmem>>, vector<1x128xf32>
    %cst_12 = arith.constant dense<0.000000e+00> : vector<1x128xf32>
    %70 = tpu.matmul %65, %0, %cst_12 {dimension_numbers = #tpu.dot_dimension_numbers<[1], [0], [0], [1], [0, 0, 1, 1], [], []>} : vector<1x32xf32>, vector<32x128xf32>, vector<1x128xf32> -> vector<1x128xf32>
    %71 = arith.addf %69, %70 : vector<1x128xf32>
    %72 = arith.negf %71 : vector<1x128xf32>
    %73 = math.exp %72 : vector<1x128xf32>
    %cst_13 = arith.constant 1.000000e+00 : f32
    %74 = vector.broadcast %cst_13 : f32 to vector<1x128xf32>
    %75 = arith.addf %74, %73 : vector<1x128xf32>
    %76 = arith.divf %74, %75 : vector<1x128xf32>
    %77 = math.tanh %71 : vector<1x128xf32>
    %78 = vector.extract_strided_slice %76 {offsets = [0, 0], sizes = [1, 32], strides = [1, 1]} : vector<1x128xf32> to vector<1x32xf32>
    %79 = vector.extract_strided_slice %76 {offsets = [0, 32], sizes = [1, 32], strides = [1, 1]} : vector<1x128xf32> to vector<1x32xf32>
    %80 = vector.extract_strided_slice %77 {offsets = [0, 64], sizes = [1, 32], strides = [1, 1]} : vector<1x128xf32> to vector<1x32xf32>
    %81 = vector.extract_strided_slice %76 {offsets = [0, 96], sizes = [1, 32], strides = [1, 1]} : vector<1x128xf32> to vector<1x32xf32>
    %82 = arith.mulf %79, %63 : vector<1x32xf32>
    %83 = arith.mulf %78, %80 : vector<1x32xf32>
    %84 = arith.addf %82, %83 : vector<1x32xf32>
    %85 = math.tanh %84 : vector<1x32xf32>
    %86 = arith.mulf %81, %85 : vector<1x32xf32>
    %c4_i32 = arith.constant 4 : i32
    %87 = arith.index_cast %c4_i32 : i32 to index
    %88 = memref.load %arg0[%87] : memref<8xi32, #tpu.memory_space<smem>>
    %89 = arith.index_cast %88 : i32 to index
    %c0_14 = arith.constant 0 : index
    %90 = vector.load %arg1[%89, %c0_14] : memref<50x128xf32, #tpu.memory_space<vmem>>, vector<1x128xf32>
    %cst_15 = arith.constant dense<0.000000e+00> : vector<1x128xf32>
    %91 = tpu.matmul %86, %0, %cst_15 {dimension_numbers = #tpu.dot_dimension_numbers<[1], [0], [0], [1], [0, 0, 1, 1], [], []>} : vector<1x32xf32>, vector<32x128xf32>, vector<1x128xf32> -> vector<1x128xf32>
    %92 = arith.addf %90, %91 : vector<1x128xf32>
    %93 = arith.negf %92 : vector<1x128xf32>
    %94 = math.exp %93 : vector<1x128xf32>
    %cst_16 = arith.constant 1.000000e+00 : f32
    %95 = vector.broadcast %cst_16 : f32 to vector<1x128xf32>
    %96 = arith.addf %95, %94 : vector<1x128xf32>
    %97 = arith.divf %95, %96 : vector<1x128xf32>
    %98 = math.tanh %92 : vector<1x128xf32>
    %99 = vector.extract_strided_slice %97 {offsets = [0, 0], sizes = [1, 32], strides = [1, 1]} : vector<1x128xf32> to vector<1x32xf32>
    %100 = vector.extract_strided_slice %97 {offsets = [0, 32], sizes = [1, 32], strides = [1, 1]} : vector<1x128xf32> to vector<1x32xf32>
    %101 = vector.extract_strided_slice %98 {offsets = [0, 64], sizes = [1, 32], strides = [1, 1]} : vector<1x128xf32> to vector<1x32xf32>
    %102 = vector.extract_strided_slice %97 {offsets = [0, 96], sizes = [1, 32], strides = [1, 1]} : vector<1x128xf32> to vector<1x32xf32>
    %103 = arith.mulf %100, %84 : vector<1x32xf32>
    %104 = arith.mulf %99, %101 : vector<1x32xf32>
    %105 = arith.addf %103, %104 : vector<1x32xf32>
    %106 = math.tanh %105 : vector<1x32xf32>
    %107 = arith.mulf %102, %106 : vector<1x32xf32>
    %c5_i32 = arith.constant 5 : i32
    %108 = arith.index_cast %c5_i32 : i32 to index
    %109 = memref.load %arg0[%108] : memref<8xi32, #tpu.memory_space<smem>>
    %110 = arith.index_cast %109 : i32 to index
    %c0_17 = arith.constant 0 : index
    %111 = vector.load %arg1[%110, %c0_17] : memref<50x128xf32, #tpu.memory_space<vmem>>, vector<1x128xf32>
    %cst_18 = arith.constant dense<0.000000e+00> : vector<1x128xf32>
    %112 = tpu.matmul %107, %0, %cst_18 {dimension_numbers = #tpu.dot_dimension_numbers<[1], [0], [0], [1], [0, 0, 1, 1], [], []>} : vector<1x32xf32>, vector<32x128xf32>, vector<1x128xf32> -> vector<1x128xf32>
    %113 = arith.addf %111, %112 : vector<1x128xf32>
    %114 = arith.negf %113 : vector<1x128xf32>
    %115 = math.exp %114 : vector<1x128xf32>
    %cst_19 = arith.constant 1.000000e+00 : f32
    %116 = vector.broadcast %cst_19 : f32 to vector<1x128xf32>
    %117 = arith.addf %116, %115 : vector<1x128xf32>
    %118 = arith.divf %116, %117 : vector<1x128xf32>
    %119 = math.tanh %113 : vector<1x128xf32>
    %120 = vector.extract_strided_slice %118 {offsets = [0, 0], sizes = [1, 32], strides = [1, 1]} : vector<1x128xf32> to vector<1x32xf32>
    %121 = vector.extract_strided_slice %118 {offsets = [0, 32], sizes = [1, 32], strides = [1, 1]} : vector<1x128xf32> to vector<1x32xf32>
    %122 = vector.extract_strided_slice %119 {offsets = [0, 64], sizes = [1, 32], strides = [1, 1]} : vector<1x128xf32> to vector<1x32xf32>
    %123 = vector.extract_strided_slice %118 {offsets = [0, 96], sizes = [1, 32], strides = [1, 1]} : vector<1x128xf32> to vector<1x32xf32>
    %124 = arith.mulf %121, %105 : vector<1x32xf32>
    %125 = arith.mulf %120, %122 : vector<1x32xf32>
    %126 = arith.addf %124, %125 : vector<1x32xf32>
    %127 = math.tanh %126 : vector<1x32xf32>
    %128 = arith.mulf %123, %127 : vector<1x32xf32>
    %c6_i32 = arith.constant 6 : i32
    %129 = arith.index_cast %c6_i32 : i32 to index
    %130 = memref.load %arg0[%129] : memref<8xi32, #tpu.memory_space<smem>>
    %131 = arith.index_cast %130 : i32 to index
    %c0_20 = arith.constant 0 : index
    %132 = vector.load %arg1[%131, %c0_20] : memref<50x128xf32, #tpu.memory_space<vmem>>, vector<1x128xf32>
    %cst_21 = arith.constant dense<0.000000e+00> : vector<1x128xf32>
    %133 = tpu.matmul %128, %0, %cst_21 {dimension_numbers = #tpu.dot_dimension_numbers<[1], [0], [0], [1], [0, 0, 1, 1], [], []>} : vector<1x32xf32>, vector<32x128xf32>, vector<1x128xf32> -> vector<1x128xf32>
    %134 = arith.addf %132, %133 : vector<1x128xf32>
    %135 = arith.negf %134 : vector<1x128xf32>
    %136 = math.exp %135 : vector<1x128xf32>
    %cst_22 = arith.constant 1.000000e+00 : f32
    %137 = vector.broadcast %cst_22 : f32 to vector<1x128xf32>
    %138 = arith.addf %137, %136 : vector<1x128xf32>
    %139 = arith.divf %137, %138 : vector<1x128xf32>
    %140 = math.tanh %134 : vector<1x128xf32>
    %141 = vector.extract_strided_slice %139 {offsets = [0, 0], sizes = [1, 32], strides = [1, 1]} : vector<1x128xf32> to vector<1x32xf32>
    %142 = vector.extract_strided_slice %139 {offsets = [0, 32], sizes = [1, 32], strides = [1, 1]} : vector<1x128xf32> to vector<1x32xf32>
    %143 = vector.extract_strided_slice %140 {offsets = [0, 64], sizes = [1, 32], strides = [1, 1]} : vector<1x128xf32> to vector<1x32xf32>
    %144 = vector.extract_strided_slice %139 {offsets = [0, 96], sizes = [1, 32], strides = [1, 1]} : vector<1x128xf32> to vector<1x32xf32>
    %145 = arith.mulf %142, %126 : vector<1x32xf32>
    %146 = arith.mulf %141, %143 : vector<1x32xf32>
    %147 = arith.addf %145, %146 : vector<1x32xf32>
    %148 = math.tanh %147 : vector<1x32xf32>
    %149 = arith.mulf %144, %148 : vector<1x32xf32>
    %c7_i32 = arith.constant 7 : i32
    %150 = arith.index_cast %c7_i32 : i32 to index
    %151 = memref.load %arg0[%150] : memref<8xi32, #tpu.memory_space<smem>>
    %152 = arith.index_cast %151 : i32 to index
    %c0_23 = arith.constant 0 : index
    %153 = vector.load %arg1[%152, %c0_23] : memref<50x128xf32, #tpu.memory_space<vmem>>, vector<1x128xf32>
    %cst_24 = arith.constant dense<0.000000e+00> : vector<1x128xf32>
    %154 = tpu.matmul %149, %0, %cst_24 {dimension_numbers = #tpu.dot_dimension_numbers<[1], [0], [0], [1], [0, 0, 1, 1], [], []>} : vector<1x32xf32>, vector<32x128xf32>, vector<1x128xf32> -> vector<1x128xf32>
    %155 = arith.addf %153, %154 : vector<1x128xf32>
    %156 = arith.negf %155 : vector<1x128xf32>
    %157 = math.exp %156 : vector<1x128xf32>
    %cst_25 = arith.constant 1.000000e+00 : f32
    %158 = vector.broadcast %cst_25 : f32 to vector<1x128xf32>
    %159 = arith.addf %158, %157 : vector<1x128xf32>
    %160 = arith.divf %158, %159 : vector<1x128xf32>
    %161 = math.tanh %155 : vector<1x128xf32>
    %162 = vector.extract_strided_slice %160 {offsets = [0, 0], sizes = [1, 32], strides = [1, 1]} : vector<1x128xf32> to vector<1x32xf32>
    %163 = vector.extract_strided_slice %160 {offsets = [0, 32], sizes = [1, 32], strides = [1, 1]} : vector<1x128xf32> to vector<1x32xf32>
    %164 = vector.extract_strided_slice %161 {offsets = [0, 64], sizes = [1, 32], strides = [1, 1]} : vector<1x128xf32> to vector<1x32xf32>
    %165 = vector.extract_strided_slice %160 {offsets = [0, 96], sizes = [1, 32], strides = [1, 1]} : vector<1x128xf32> to vector<1x32xf32>
    %166 = arith.mulf %163, %147 : vector<1x32xf32>
    %167 = arith.mulf %162, %164 : vector<1x32xf32>
    %168 = arith.addf %166, %167 : vector<1x32xf32>
    %169 = math.tanh %168 : vector<1x32xf32>
    %170 = arith.mulf %165, %169 : vector<1x32xf32>
    %c8_i32 = arith.constant 8 : i32
    %c0_26 = arith.constant 0 : index
    %c0_27 = arith.constant 0 : index
    %171 = vector.load %arg3[%c0_26, %c0_27] : memref<32x3xf32, #tpu.memory_space<vmem>>, vector<32x3xf32>
    %cst_28 = arith.constant dense<0.000000e+00> : vector<1x3xf32>
    %172 = tpu.matmul %170, %171, %cst_28 {dimension_numbers = #tpu.dot_dimension_numbers<[1], [0], [0], [1], [0, 0, 1, 1], [], []>} : vector<1x32xf32>, vector<32x3xf32>, vector<1x3xf32> -> vector<1x3xf32>
    %c0_29 = arith.constant 0 : index
    %c0_30 = arith.constant 0 : index
    %173 = vector.load %arg4[%c0_29, %c0_30] : memref<1x3xf32, #tpu.memory_space<vmem>>, vector<1x3xf32>
    %174 = arith.addf %172, %173 : vector<1x3xf32>
    %cst_31 = arith.constant dense<0xFF800000> : vector<1xf32>
    %175 = vector.multi_reduction <maximumf>, %174, %cst_31 [1] : vector<1x3xf32> to vector<1xf32>
    %176 = vector.shape_cast %175 : vector<1xf32> to vector<1x1xf32>
    %177 = vector.broadcast %176 : vector<1x1xf32> to vector<1x3xf32>
    %178 = arith.subf %174, %177 : vector<1x3xf32>
    %179 = math.exp %178 : vector<1x3xf32>
    %cst_32 = arith.constant dense<0.000000e+00> : vector<1xf32>
    %180 = vector.multi_reduction <add>, %179, %cst_32 [1] : vector<1x3xf32> to vector<1xf32>
    %181 = vector.shape_cast %180 : vector<1xf32> to vector<1x1xf32>
    %182 = math.log %181 : vector<1x1xf32>
    %183 = vector.broadcast %182 : vector<1x1xf32> to vector<1x3xf32>
    %184 = arith.subf %178, %183 : vector<1x3xf32>
    %c0_33 = arith.constant 0 : index
    %c0_34 = arith.constant 0 : index
    %185 = vector.load %arg5[%c0_33, %c0_34] : memref<1x3xf32, #tpu.memory_space<vmem>>, vector<1x3xf32>
    tpu.vector_store %arg5[%c0_33, %c0_34], %184 {strides = array<i32>} : memref<1x3xf32, #tpu.memory_space<vmem>>, vector<1x3xf32>,
    return
  }
}

</mosaic_0001>

<bundles_post_ra>
// kernel: tpu_custom_call.1
= control target key start
LH: loop header
LB: loop body
LE: loop exit
PB: predicated region body
PF: predicated region fallthrough
CT: control target
= control target key end

     0   :  { %10 = vsyncpa [#allocation5], 0  ;;  %s1548_s0 = inlined_call_operand.vmem [shape: s32[8], index: 0, kind: input, shape index: {}]   ;;  %s1549_s1 = inlined_call_operand.hbm [shape: f32[50,128], index: 1, kind: input, shape index: {}]   ;;  %s1550_s2 = inlined_call_operand.vmem [shape: f32[32,128], index: 2, kind: input, shape index: {}]   ;;  %s1551_s3 = inlined_call_operand.vmem [shape: f32[32,3], index: 3, kind: input, shape index: {}]   ;;  %s1552_s4 = inlined_call_operand.vmem [shape: f32[1,3], index: 4, kind: input, shape index: {}]   ;;  %s1553_s5 = inlined_call_operand.hbm [shape: f32[1,3], index: 5, kind: output, shape index: {}]  }
   0x1   :  { %11 = vsyncpa [#allocation3], 0 }
   0x2   :  { %12 = vsyncpa [#allocation4], 0  ;;  %s19_s20 = sshll.u32 %s1548_s0, 4  ;;  %s20_s20 = int_to_ptr.vmem [resolvable:$true] %s19_s20 }
   0x3   :  { %s1292_s21 = scalar_lea.vmem %s20_s20, 16  ;;  %p1297_p1 = scmp.lt.s32.totalorder %s20_s20, %s20_s20 }
   0x4   :  { %p1293_p0 = scmp.ne.s32.totalorder %s20_s20, %s1292_s21  ;;  %p1298_p2 = scmp.lt.s32.totalorder %s1292_s21, %s1292_s21 }
   0x6   :  { %p1299_p3 = por %p1298_p2, %p1297_p1 }
   0x8   :  { %p1300_p4 = pnand %p1299_p3, %p1293_p0 }
   0xa   :  { %1303 = shalt.err (!%p1300_p4)
}
   0xb   :  { %s1354_s22 = smov [#allocation2]   ;;  %s1355_s23 = smov [#allocation6]  }
   0xc   :  { %22 = dma.vmem_to_smem %s20_s20, 16, %s1354_s22, [#allocation5]  }
   0xd   :  { %s28_s24 = sshll.u32 %s1355_s23, 4  ;;  %s1304_s27 = scalar_lea.hbm %s1549_s1, 896  ;;  %s29_s24 = int_to_ptr.vmem [resolvable:$true] %s28_s24 }
   0xe   :  { %p1305_p5 = scmp.ne.s32.totalorder %s1549_s1, %s1304_s27  ;;  %p1308_p6 = scmp.lt.u32.totalorder %s1304_s27, %s1549_s1 }
  0x10   :  { %p1310_p7 = pnand %p1308_p6, %p1305_p5 }
  0x12   :  { %1313 = shalt.err (!%p1310_p7)
}
  0x13   :  { %s1314_s6 = scalar_lea.vmem %s29_s24, 896  ;;  %p1319_p9 = scmp.lt.s32.totalorder %s29_s24, %s29_s24 }
  0x14   :  { %p1315_p8 = scmp.ne.s32.totalorder %s29_s24, %s1314_s6  ;;  %p1320_p10 = scmp.lt.s32.totalorder %s1314_s6, %s1314_s6 }
  0x16   :  { %p1321_p11 = por %p1320_p10, %p1319_p9 }
  0x18   :  { %p1322_p12 = pnand %p1321_p11, %p1315_p8 }
  0x1a   :  { %1325 = shalt.err (!%p1322_p12)
}
  0x1b   :  { %s1356_s7 = smov 128   ;;  %s1357_s8 = smov 8  }
  0x1c   :  { %34 = dma.hbm_to_vmem [thread:$0]  %s1549_s1, 896, %s29_s24, [#allocation3], %s1356_s7, %s1356_s7, %s1357_s8  }
  0x1d   :  { %1348 = dma.done.wait [#allocation5], 16  }
  0x1e   :  { %1349 = vsyncadd [#allocation5], 4294967280 }
  0x1f   :  { %1350 = dma.done.wait [#allocation3], 896  }
  0x20   :  { %1351 = vsyncadd [#allocation3], 4294966400 }
  0x21   :  { %47 = sfence }
  0x22   :  { %v48_v0 = vld [vmem:[%s1550_s2] sm:$0xff]  ;;  %v49_v1 = vld [vmem:[%s1550_s2 + $0x8] sm:$0xff]  ;;  %v50_v2 = vld [vmem:[%s1550_s2 + $0x10] sm:$0xff]  ;;  %v1358_v3 = vmov 0.0|0.0   ;;  %vm1359_vm0 = vmmov 0   ;;  %v1360_v6 = vmov 0.0  }
  0x23   :  { %1160 = vmatprep.subr.bf16.mxu0 %v1358_v3  ;;  %v1419_v4 = vpack.c.bf16 %v49_v1, %v48_v0  ;;  %v51_v5 = vld [vmem:[%s1550_s2 + $0x18] sm:$0xff]  ;;  %1069 = vmatprep.mubr.msk.f32.mxu0 %vm1359_vm0, %v1360_v6  ;;  %s52_s2 = sld [smem:[#allocation2]]  ;;  %s1361_s19 = smov 64   ;;  %vm55_vm1 = vcmask 261120   ;;  %vm955_vm2 = vcmask 16384  }
  0x24   :  { %1166 = vmatprep.subr.bf16.mxu1 %v1358_v3  ;;  %1080 = vmatprep.mubr.msk.f32.mxu1 %vm1359_vm0, %v1360_v6  ;;  %v1430_v7 = vpack.c.bf16 %v51_v5, %v50_v2  ;;  %s1362_s20 = smov 32   ;;  %s994_s21 = sld [smem:[#allocation2 + $0x1]] }
  0x25   :  { %1162 = vmatpush3.bf16.msra.mxu0 %v1419_v4  ;;  %1168 = vmatpush3.bf16.msra.mxu1 %v1419_v4  ;;  %s997_s23 = sld [smem:[#allocation2 + $0x2]]  ;;  %s1000_s25 = sld [smem:[#allocation2 + $0x3]] }
  0x26   :  { %1163 = vmatprep.subr.bf16.mxu0 %v1358_v3  ;;  %1169 = vmatprep.subr.bf16.mxu1 %v1358_v3  ;;  %s1003_s27 = sld [smem:[#allocation2 + $0x4]]  ;;  %s1006_s29 = sld [smem:[#allocation2 + $0x5]] }
  0x27   :  { %s1009_s30 = sld [smem:[#allocation2 + $0x6]]  ;;  %s1012_s7 = sld [smem:[#allocation2 + $0x7]] }
  0x29   :  { %1165 = vmatpush3.bf16.msra.mxu0 %v1430_v7  ;;  %1171 = vmatpush3.bf16.msra.mxu1 %v1430_v7  ;;  %s53_s18 = scalar_lea.vmem [#allocation6], %s52_s2 }
  0x2a   :  { %1172 = vmatprep.subr.bf16.mxu0 %v1358_v3  ;;  %1178 = vmatprep.subr.bf16.mxu1 %v1358_v3  ;;  %v54_v8 = vld [vmem:[%s53_s18] sm:$0x1]  ;;  %s155_s22 = scalar_lea.vmem [#allocation6], %s994_s21 }
  0x2b   :  { %v156_v26 = vld [vmem:[%s155_s22] sm:$0x1]  ;;  %s258_s24 = scalar_lea.vmem [#allocation6], %s997_s23  ;;  %s361_s26 = scalar_lea.vmem [#allocation6], %s1000_s25 }
  0x2c   :  { %1070 = vmatmul.mubr.f32.vlgmr.msra.gmra.mrb[0].mxu0 %v1360_v6  ;;  %v259_v44 = vld [vmem:[%s258_s24] sm:$0x1]  ;;  %s464_s28 = scalar_lea.vmem [#allocation6], %s1003_s27  ;;  %s567_s0 = scalar_lea.vmem [#allocation6], %s1006_s29 }
  0x2d   :  { %1174 = vmatpush3.bf16.msra.mxu0 %v1419_v4  ;;  %1091 = vmatprep.mubr.msk.f32.mxu0 %vm1359_vm0, %v1360_v6  ;;  %v362_v62 = vld [vmem:[%s361_s26] sm:$0x1]  ;;  %s670_s6 = scalar_lea.vmem [#allocation6], %s1009_s30  ;;  %s773_s8 = scalar_lea.vmem [#allocation6], %s1012_s7 }
  0x2e   :  { %1175 = vmatprep.subr.bf16.mxu0 %v1358_v3 }
  0x31   :  { %1177 = vmatpush3.bf16.msra.mxu0 %v1430_v7 }
  0x32   :  { %1184 = vmatprep.subr.bf16.mxu0 %v1358_v3 }
  0xff   :  { %v125_v9 = vpop.f32.mrb[0].mxu0 }
 0x100   :  { %v129_v10 = vadd.f32 %v125_v9, %v54_v8  ;;  %v1071_v11 = vpop.f32.mrb[1].mxu0 }
 0x102   :  { %1224 = vtanh.f32 %v129_v10  ;;  %v993_v13 = vmul.f32 -1.442695, %v129_v10 }
 0x104   :  { %1226 = vpow2.f32 %v993_v13 }
 0x10c   :  { %v1225_v12 = vpop.eup %1224 }
 0x10d   :  { %139 = vrot.lane.b32.xlu0 %v1225_v12, %s1361_s19 }
 0x10e   :  { %v1227_v14 = vpop.eup %1226 }
 0x10f   :  { %v133_v15 = vadd.f32 1.0, %v1227_v14 }
 0x111   :  { %1228 = vrcp.f32 %v133_v15 }
 0x11b   :  { %v1229_v16 = vpop.eup %1228 }
 0x11c   :  { %v137_v19 = vmul.f32 0.0, %v1229_v16 }
 0x17f   :  { %v140_v17 = vpop.permute.xlu0 %139 }
 0x180   :  { %v142_v18 = vmul.f32 %v1229_v16, %v140_v17 }
 0x182   :  { %144 = vrot.lane.b32.xlu0 %v142_v18, %s1362_s20 }
 0x1f4   :  { %v145_v20 = vpop.permute.xlu0 %144 }
 0x1f5   :  { %v147_v21 = vadd.f32 %v145_v20, %v137_v19  ;;  %v465_v20 = vld [vmem:[%s464_s28] sm:$0x1] }
 0x1f7   :  { %1230 = vtanh.f32 %v147_v21 }
 0x201   :  { %v1231_v22 = vpop.eup %1230 }
 0x202   :  { %150 = vrot.lane.b32.xlu1 %v1231_v22, %s1361_s19 }
 0x274   :  { %v151_v23 = vpop.permute.xlu1 %150 }
 0x275   :  { %v153_v24 = vmul.f32 %v1229_v16, %v151_v23 }
 0x277   :  { %158 = vrot.lane.b32.xlu1 %v153_v24, %s1362_s20 }
 0x2e9   :  { %v159_v25 = vpop.permute.xlu1 %158 }
 0x2ea   :  { %1081 = vmatmul.mubr.msk.f32.vlgmr.msra.gmra.mrb[0].mxu1 %vm55_vm1, %v159_v25 }
 0x2eb   :  { %1180 = vmatpush3.bf16.msra.mxu1 %v1419_v4  ;;  %1102 = vmatprep.mubr.msk.f32.mxu1 %vm1359_vm0, %v1360_v6 }
 0x2ec   :  { %1181 = vmatprep.subr.bf16.mxu1 %v1358_v3 }
 0x2ef   :  { %1183 = vmatpush3.bf16.msra.mxu1 %v1430_v7 }
 0x2f0   :  { %1190 = vmatprep.subr.bf16.mxu1 %v1358_v3 }
 0x3bd   :  { %v228_v27 = vpop.f32.mrb[0].mxu1 }
 0x3be   :  { %v232_v28 = vadd.f32 %v228_v27, %v156_v26  ;;  %v1082_v29 = vpop.f32.mrb[1].mxu1 }
 0x3c0   :  { %1232 = vtanh.f32 %v232_v28  ;;  %v996_v31 = vmul.f32 -1.442695, %v232_v28 }
 0x3c2   :  { %1234 = vpow2.f32 %v996_v31 }
 0x3ca   :  { %v1233_v30 = vpop.eup %1232 }
 0x3cb   :  { %242 = vrot.lane.b32.xlu0 %v1233_v30, %s1361_s19 }
 0x3cc   :  { %v1235_v32 = vpop.eup %1234 }
 0x3cd   :  { %v236_v33 = vadd.f32 1.0, %v1235_v32 }
 0x3cf   :  { %1236 = vrcp.f32 %v236_v33 }
 0x3d9   :  { %v1237_v34 = vpop.eup %1236 }
 0x3da   :  { %v240_v37 = vmul.f32 %v1237_v34, %v147_v21 }
 0x43d   :  { %v243_v35 = vpop.permute.xlu0 %242 }
 0x43e   :  { %v245_v36 = vmul.f32 %v1237_v34, %v243_v35 }
 0x440   :  { %247 = vrot.lane.b32.xlu1 %v245_v36, %s1362_s20 }
 0x4b2   :  { %v248_v38 = vpop.permute.xlu1 %247 }
 0x4b3   :  { %v250_v39 = vadd.f32 %v248_v38, %v240_v37  ;;  %v568_v38 = vld [vmem:[%s567_s0] sm:$0x1] }
 0x4b5   :  { %1238 = vtanh.f32 %v250_v39 }
 0x4bf   :  { %v1239_v40 = vpop.eup %1238 }
 0x4c0   :  { %253 = vrot.lane.b32.xlu0 %v1239_v40, %s1361_s19 }
 0x532   :  { %v254_v41 = vpop.permute.xlu0 %253 }
 0x533   :  { %v256_v42 = vmul.f32 %v1237_v34, %v254_v41 }
 0x535   :  { %261 = vrot.lane.b32.xlu1 %v256_v42, %s1362_s20 }
 0x5a7   :  { %v262_v43 = vpop.permute.xlu1 %261 }
 0x5a8   :  { %1092 = vmatmul.mubr.msk.f32.vlgmr.msra.gmra.mrb[2].mxu0 %vm55_vm1, %v262_v43 }
 0x5a9   :  { %1186 = vmatpush3.bf16.msra.mxu0 %v1419_v4  ;;  %1113 = vmatprep.mubr.msk.f32.mxu0 %vm1359_vm0, %v1360_v6 }
 0x5aa   :  { %1187 = vmatprep.subr.bf16.mxu0 %v1358_v3 }
 0x5ad   :  { %1189 = vmatpush3.bf16.msra.mxu0 %v1430_v7 }
 0x5ae   :  { %1196 = vmatprep.subr.bf16.mxu0 %v1358_v3 }
 0x67b   :  { %v331_v45 = vpop.f32.mrb[2].mxu0 }
 0x67c   :  { %v335_v46 = vadd.f32 %v331_v45, %v259_v44  ;;  %v1093_v47 = vpop.f32.mrb[3].mxu0 }
 0x67e   :  { %1240 = vtanh.f32 %v335_v46  ;;  %v999_v49 = vmul.f32 -1.442695, %v335_v46 }
 0x680   :  { %1242 = vpow2.f32 %v999_v49 }
 0x688   :  { %v1241_v48 = vpop.eup %1240 }
 0x689   :  { %345 = vrot.lane.b32.xlu0 %v1241_v48, %s1361_s19 }
 0x68a   :  { %v1243_v50 = vpop.eup %1242 }
 0x68b   :  { %v339_v51 = vadd.f32 1.0, %v1243_v50 }
 0x68d   :  { %1244 = vrcp.f32 %v339_v51 }
 0x697   :  { %v1245_v52 = vpop.eup %1244 }
 0x698   :  { %v343_v55 = vmul.f32 %v1245_v52, %v250_v39 }
 0x6fb   :  { %v346_v53 = vpop.permute.xlu0 %345 }
 0x6fc   :  { %v348_v54 = vmul.f32 %v1245_v52, %v346_v53 }
 0x6fe   :  { %350 = vrot.lane.b32.xlu1 %v348_v54, %s1362_s20  ;;  %v671_v54 = vld [vmem:[%s670_s6] sm:$0x1] }
 0x770   :  { %v351_v56 = vpop.permute.xlu1 %350 }
 0x771   :  { %v353_v57 = vadd.f32 %v351_v56, %v343_v55 }
 0x773   :  { %1246 = vtanh.f32 %v353_v57 }
 0x77d   :  { %v1247_v58 = vpop.eup %1246 }
 0x77e   :  { %356 = vrot.lane.b32.xlu0 %v1247_v58, %s1361_s19 }
 0x7f0   :  { %v357_v59 = vpop.permute.xlu0 %356 }
 0x7f1   :  { %v359_v60 = vmul.f32 %v1245_v52, %v357_v59 }
 0x7f3   :  { %364 = vrot.lane.b32.xlu1 %v359_v60, %s1362_s20 }
 0x865   :  { %v365_v61 = vpop.permute.xlu1 %364 }
 0x866   :  { %1103 = vmatmul.mubr.msk.f32.vlgmr.msra.gmra.mrb[2].mxu1 %vm55_vm1, %v365_v61 }
 0x867   :  { %1192 = vmatpush3.bf16.msra.mxu1 %v1419_v4  ;;  %1124 = vmatprep.mubr.msk.f32.mxu1 %vm1359_vm0, %v1360_v6 }
 0x868   :  { %1193 = vmatprep.subr.bf16.mxu1 %v1358_v3 }
 0x86b   :  { %1195 = vmatpush3.bf16.msra.mxu1 %v1430_v7 }
 0x86c   :  { %1202 = vmatprep.subr.bf16.mxu1 %v1358_v3 }
 0x939   :  { %v434_v63 = vpop.f32.mrb[2].mxu1 }
 0x93a   :  { %v438_v0 = vadd.f32 %v434_v63, %v362_v62  ;;  %v1104_v1 = vpop.f32.mrb[3].mxu1 }
 0x93c   :  { %1248 = vtanh.f32 %v438_v0  ;;  %v1002_v5 = vmul.f32 -1.442695, %v438_v0 }
 0x93e   :  { %1250 = vpow2.f32 %v1002_v5 }
 0x946   :  { %v1249_v2 = vpop.eup %1248 }
 0x947   :  { %448 = vrot.lane.b32.xlu0 %v1249_v2, %s1361_s19 }
 0x948   :  { %v1251_v8 = vpop.eup %1250 }
 0x949   :  { %v442_v9 = vadd.f32 1.0, %v1251_v8 }
 0x94b   :  { %1252 = vrcp.f32 %v442_v9 }
 0x955   :  { %v1253_v10 = vpop.eup %1252 }
 0x956   :  { %v446_v13 = vmul.f32 %v1253_v10, %v353_v57 }
 0x9b9   :  { %v449_v11 = vpop.permute.xlu0 %448 }
 0x9ba   :  { %v451_v12 = vmul.f32 %v1253_v10, %v449_v11  ;;  %v774_v11 = vld [vmem:[%s773_s8] sm:$0x1] }
 0x9bc   :  { %453 = vrot.lane.b32.xlu1 %v451_v12, %s1362_s20 }
 0xa2e   :  { %v454_v14 = vpop.permute.xlu1 %453 }
 0xa2f   :  { %v456_v15 = vadd.f32 %v454_v14, %v446_v13 }
 0xa31   :  { %1254 = vtanh.f32 %v456_v15 }
 0xa3b   :  { %v1255_v16 = vpop.eup %1254 }
 0xa3c   :  { %459 = vrot.lane.b32.xlu0 %v1255_v16, %s1361_s19 }
 0xaae   :  { %v460_v17 = vpop.permute.xlu0 %459 }
 0xaaf   :  { %v462_v18 = vmul.f32 %v1253_v10, %v460_v17 }
 0xab1   :  { %467 = vrot.lane.b32.xlu1 %v462_v18, %s1362_s20 }
 0xb23   :  { %v468_v19 = vpop.permute.xlu1 %467 }
 0xb24   :  { %1114 = vmatmul.mubr.msk.f32.vlgmr.msra.gmra.mrb[4].mxu0 %vm55_vm1, %v468_v19 }
 0xb25   :  { %1198 = vmatpush3.bf16.msra.mxu0 %v1419_v4  ;;  %1135 = vmatprep.mubr.msk.f32.mxu0 %vm1359_vm0, %v1360_v6 }
 0xb26   :  { %1199 = vmatprep.subr.bf16.mxu0 %v1358_v3 }
 0xb29   :  { %1201 = vmatpush3.bf16.msra.mxu0 %v1430_v7 }
 0xb2a   :  { %1208 = vmatprep.subr.bf16.mxu0 %v1358_v3 }
 0xbf7   :  { %v537_v21 = vpop.f32.mrb[4].mxu0 }
 0xbf8   :  { %v541_v22 = vadd.f32 %v537_v21, %v465_v20  ;;  %v1115_v23 = vpop.f32.mrb[5].mxu0 }
 0xbfa   :  { %1256 = vtanh.f32 %v541_v22  ;;  %v1005_v25 = vmul.f32 -1.442695, %v541_v22 }
 0xbfc   :  { %1258 = vpow2.f32 %v1005_v25  ;;  %v875_v25 = vld [vmem:[%s1551_s3] sm:$0xff] }
 0xc04   :  { %v1257_v24 = vpop.eup %1256 }
 0xc05   :  { %551 = vrot.lane.b32.xlu0 %v1257_v24, %s1361_s19 }
 0xc06   :  { %v1259_v26 = vpop.eup %1258 }
 0xc07   :  { %v545_v27 = vadd.f32 1.0, %v1259_v26  ;;  %v876_v26 = vld [vmem:[%s1551_s3 + $0x8] sm:$0xff] }
 0xc09   :  { %1260 = vrcp.f32 %v545_v27  ;;  %v877_v27 = vld [vmem:[%s1551_s3 + $0x10] sm:$0xff] }
 0xc13   :  { %v1261_v28 = vpop.eup %1260 }
 0xc14   :  { %v549_v31 = vmul.f32 %v1261_v28, %v456_v15 }
 0xc77   :  { %v552_v29 = vpop.permute.xlu0 %551 }
 0xc78   :  { %v554_v30 = vmul.f32 %v1261_v28, %v552_v29  ;;  %v878_v29 = vld [vmem:[%s1551_s3 + $0x18] sm:$0xff]  ;;  %s1363_s3 = smov [#allocation7]  }
 0xc7a   :  { %556 = vrot.lane.b32.xlu1 %v554_v30, %s1362_s20  ;;  %v1212_v30 = vpack.c.bf16 %v878_v29, %v877_v27 }
 0xcec   :  { %v557_v32 = vpop.permute.xlu1 %556 }
 0xced   :  { %v559_v33 = vadd.f32 %v557_v32, %v549_v31 }
 0xcef   :  { %1262 = vtanh.f32 %v559_v33 }
 0xcf9   :  { %v1263_v34 = vpop.eup %1262 }
 0xcfa   :  { %562 = vrot.lane.b32.xlu0 %v1263_v34, %s1361_s19 }
 0xd6c   :  { %v563_v35 = vpop.permute.xlu0 %562 }
 0xd6d   :  { %v565_v36 = vmul.f32 %v1261_v28, %v563_v35  ;;  %v1209_v28 = vpack.c.bf16 %v876_v26, %v875_v25  ;;  %v879_v35 = vld [vmem:[%s1552_s4] sm:$0x1]  ;;  %s975_s4 = sshll.u32 %s1363_s3, 4  ;;  %s976_s4 = int_to_ptr.vmem [resolvable:$true] %s975_s4 }
 0xd6e   :  { %s1326_s2 = scalar_lea.vmem %s976_s4, 16  ;;  %s1330_s18 = scalar_lea.vmem %s976_s4, 32 }
 0xd6f   :  { %570 = vrot.lane.b32.xlu1 %v565_v36, %s1362_s20  ;;  %p1327_p13 = scmp.ne.s32.totalorder %s976_s4, %s1326_s2  ;;  %p1331_p0 = scmp.lt.s32.totalorder %s976_s4, %s976_s4 }
 0xd70   :  { %p1332_p1 = scmp.lt.s32.totalorder %s1330_s18, %s1326_s2 }
 0xd72   :  { %p1333_p2 = por %p1332_p1, %p1331_p0 }
 0xd74   :  { %p1334_p3 = pnand %p1333_p2, %p1327_p13 }
 0xde1   :  { %v571_v37 = vpop.permute.xlu1 %570 }
 0xde2   :  { %1125 = vmatmul.mubr.msk.f32.vlgmr.msra.gmra.mrb[4].mxu1 %vm55_vm1, %v571_v37 }
 0xde3   :  { %1204 = vmatpush3.bf16.msra.mxu1 %v1419_v4  ;;  %1146 = vmatprep.mubr.msk.f32.mxu1 %vm1359_vm0, %v1360_v6 }
 0xde4   :  { %1205 = vmatprep.subr.bf16.mxu1 %v1358_v3 }
 0xde7   :  { %1207 = vmatpush3.bf16.msra.mxu1 %v1430_v7 }
 0xeb5   :  { %v640_v39 = vpop.f32.mrb[4].mxu1 }
 0xeb6   :  { %v644_v40 = vadd.f32 %v640_v39, %v568_v38  ;;  %v1126_v41 = vpop.f32.mrb[5].mxu1 }
 0xeb8   :  { %1264 = vtanh.f32 %v644_v40  ;;  %v1008_v43 = vmul.f32 -1.442695, %v644_v40 }
 0xeba   :  { %1266 = vpow2.f32 %v1008_v43 }
 0xec2   :  { %v1265_v42 = vpop.eup %1264 }
 0xec3   :  { %654 = vrot.lane.b32.xlu0 %v1265_v42, %s1361_s19 }
 0xec4   :  { %v1267_v4 = vpop.eup %1266 }
 0xec5   :  { %v648_v44 = vadd.f32 1.0, %v1267_v4 }
 0xec7   :  { %1268 = vrcp.f32 %v648_v44 }
 0xed1   :  { %v1269_v45 = vpop.eup %1268 }
 0xed2   :  { %v652_v7 = vmul.f32 %v1269_v45, %v559_v33 }
 0xf35   :  { %v655_v46 = vpop.permute.xlu0 %654 }
 0xf36   :  { %v657_v47 = vmul.f32 %v1269_v45, %v655_v46 }
 0xf38   :  { %659 = vrot.lane.b32.xlu1 %v657_v47, %s1362_s20 }
 0xfaa   :  { %v660_v48 = vpop.permute.xlu1 %659 }
 0xfab   :  { %v662_v49 = vadd.f32 %v660_v48, %v652_v7 }
 0xfad   :  { %1270 = vtanh.f32 %v662_v49 }
 0xfb7   :  { %v1271_v50 = vpop.eup %1270 }
 0xfb8   :  { %665 = vrot.lane.b32.xlu0 %v1271_v50, %s1361_s19 }
0x102a   :  { %v666_v51 = vpop.permute.xlu0 %665 }
0x102b   :  { %v668_v52 = vmul.f32 %v1269_v45, %v666_v51 }
0x102d   :  { %673 = vrot.lane.b32.xlu1 %v668_v52, %s1362_s20 }
0x109f   :  { %v674_v53 = vpop.permute.xlu1 %673 }
0x10a0   :  { %1136 = vmatmul.mubr.msk.f32.vlgmr.msra.gmra.mrb[6].mxu0 %vm55_vm1, %v674_v53 }
0x10a1   :  { %1157 = vmatprep.mubr.msk.f32.mxu0 %vm1359_vm0, %v1360_v6  ;;  %1210 = vmatpush3.bf16.msra.mxu0 %v1209_v28 }
0x10a2   :  { %1211 = vmatprep.subr.bf16.mxu0 %v1358_v3 }
0x10a5   :  { %1213 = vmatpush3.bf16.msra.mxu0 %v1212_v30 }
0x1173   :  { %v743_v55 = vpop.f32.mrb[6].mxu0 }
0x1174   :  { %v747_v56 = vadd.f32 %v743_v55, %v671_v54  ;;  %v1137_v57 = vpop.f32.mrb[7].mxu0 }
0x1176   :  { %1272 = vtanh.f32 %v747_v56  ;;  %v1011_v59 = vmul.f32 -1.442695, %v747_v56 }
0x1178   :  { %1274 = vpow2.f32 %v1011_v59 }
0x1180   :  { %v1273_v58 = vpop.eup %1272 }
0x1181   :  { %757 = vrot.lane.b32.xlu0 %v1273_v58, %s1361_s19 }
0x1182   :  { %v1275_v60 = vpop.eup %1274 }
0x1183   :  { %v751_v61 = vadd.f32 1.0, %v1275_v60 }
0x1185   :  { %1276 = vrcp.f32 %v751_v61 }
0x118f   :  { %v1277_v62 = vpop.eup %1276 }
0x1190   :  { %v755_v6 = vmul.f32 %v1277_v62, %v662_v49 }
0x11f3   :  { %v758_v63 = vpop.permute.xlu0 %757 }
0x11f4   :  { %v760_v0 = vmul.f32 %v1277_v62, %v758_v63 }
0x11f6   :  { %762 = vrot.lane.b32.xlu1 %v760_v0, %s1362_s20 }
0x1268   :  { %v763_v1 = vpop.permute.xlu1 %762 }
0x1269   :  { %v765_v2 = vadd.f32 %v763_v1, %v755_v6 }
0x126b   :  { %1278 = vtanh.f32 %v765_v2 }
0x1275   :  { %v1279_v5 = vpop.eup %1278 }
0x1276   :  { %768 = vrot.lane.b32.xlu0 %v1279_v5, %s1361_s19 }
0x12e8   :  { %v769_v8 = vpop.permute.xlu0 %768 }
0x12e9   :  { %v771_v9 = vmul.f32 %v1277_v62, %v769_v8 }
0x12eb   :  { %776 = vrot.lane.b32.xlu1 %v771_v9, %s1362_s20 }
0x135d   :  { %v777_v10 = vpop.permute.xlu1 %776 }
0x135e   :  { %1147 = vmatmul.mubr.msk.f32.vlgmr.msra.gmra.mrb[6].mxu1 %vm55_vm1, %v777_v10 }
0x1431   :  { %v846_v12 = vpop.f32.mrb[6].mxu1 }
0x1432   :  { %v850_v13 = vadd.f32 %v846_v12, %v774_v11  ;;  %v1148_v14 = vpop.f32.mrb[7].mxu1 }
0x1434   :  { %1280 = vtanh.f32 %v850_v13  ;;  %v1014_v16 = vmul.f32 -1.442695, %v850_v13 }
0x1436   :  { %1282 = vpow2.f32 %v1014_v16 }
0x143e   :  { %v1281_v15 = vpop.eup %1280 }
0x143f   :  { %860 = vrot.lane.b32.xlu0 %v1281_v15, %s1361_s19 }
0x1440   :  { %v1283_v17 = vpop.eup %1282 }
0x1441   :  { %v854_v18 = vadd.f32 1.0, %v1283_v17 }
0x1443   :  { %1284 = vrcp.f32 %v854_v18 }
0x144d   :  { %v1285_v19 = vpop.eup %1284 }
0x144e   :  { %v858_v22 = vmul.f32 %v1285_v19, %v765_v2 }
0x14b1   :  { %v861_v20 = vpop.permute.xlu0 %860 }
0x14b2   :  { %v863_v21 = vmul.f32 %v1285_v19, %v861_v20 }
0x14b4   :  { %865 = vrot.lane.b32.xlu1 %v863_v21, %s1362_s20 }
0x1526   :  { %v866_v23 = vpop.permute.xlu1 %865 }
0x1527   :  { %v868_v24 = vadd.f32 %v866_v23, %v858_v22 }
0x1529   :  { %1286 = vtanh.f32 %v868_v24 }
0x1533   :  { %v1287_v31 = vpop.eup %1286 }
0x1534   :  { %871 = vrot.lane.b32.xlu0 %v1287_v31, %s1361_s19 }
0x15a6   :  { %v872_v32 = vpop.permute.xlu0 %871 }
0x15a7   :  { %v874_v33 = vmul.f32 %v1285_v19, %v872_v32 }
0x15a9   :  { %881 = vrot.lane.b32.xlu1 %v874_v33, %s1362_s20 }
0x161b   :  { %v882_v34 = vpop.permute.xlu1 %881 }
0x161c   :  { %1158 = vmatmul.mubr.msk.f32.vlgmr.msra.gmra.mrb[8].mxu0 %vm55_vm1, %v882_v34 }
0x16ef   :  { %v951_v36 = vpop.f32.mrb[8].mxu0 }
0x16f0   :  { %v952_v37 = vadd.f32 %v951_v36, %v879_v35  ;;  %v1159_v38 = vpop.f32.mrb[9].mxu0 }
0x16f2   :  { %v956_v3 = vsel %vm955_vm2, %v952_v37, -inf }
0x16f3   :  { %957 = vmax.xlane.f32.xlu0 %v956_v3 }
0x1780   :  { %v958_v39 = vpop.xlane.xlu0 %957 }
0x1781   :  { %v959_v40 = vsub.f32 %v952_v37, %v958_v39 }
0x1783   :  { %v960_v41 = vmul.f32 1.442695, %v959_v40 }
0x1785   :  { %1288 = vpow2.f32 %v960_v41 }
0x178f   :  { %v1289_v42 = vpop.eup %1288 }
0x1790   :  { %v962_v43 = vsel %vm955_vm2, %v1289_v42, 0.0 }
0x1791   :  { %963 = vadd.xlane.f32.xlu1 %v962_v43 }
0x181e   :  { %v964_v4 = vpop.xlane.xlu1 %963 }
0x181f   :  { %1290 = vlog2.f32 %v964_v4 }
0x1829   :  { %v1291_v44 = vpop.eup %1290 }
0x182a   :  { %v966_v45 = vmul.f32 0.6931472, %v1291_v44 }
0x182c   :  { %v967_v46 = vsub.f32 %v959_v40, %v966_v45 }
0x182e   :  { %968 = vst.msk [vmem:[#allocation7] sm:$0x1] %vm955_vm2, %v967_v46 }
0x182f   :  { %1337 = shalt.err (!%p1334_p3)
}
0x1830   :  { %s1338_s21 = scalar_lea.hbm %s1553_s5, 16 }
0x1831   :  { %p1339_p4 = scmp.ne.s32.totalorder %s1553_s5, %s1338_s21  ;;  %p1342_p5 = scmp.lt.u32.totalorder %s1338_s21, %s1553_s5 }
0x1833   :  { %p1344_p6 = pnand %p1342_p5, %p1339_p4 }
0x1835   :  { %1347 = shalt.err (!%p1344_p6)
}
0x1836   :  { %978 = dma.vmem_to_hbm [thread:$0]  %s976_s4, 16, %s1553_s5, [#allocation4]  }
0x1837   :  { %1352 = dma.done.wait [#allocation4], 16  }
0x1838   :  { %1353 = vsyncadd [#allocation4], 4294967280 }
0x1839   :  { %982 = vsyncpa [#allocation3], 1 }
0x183a   :  { %983 = vsyncpa [#allocation4], 1 }
0x183b   :  { %984 = vsyncpa [#allocation5], 1 }

</bundles_post_ra>
